<compile_context>
chip_gen: v7x
topology: tpu7x:2x2x1
jax: 0.10.0
libtpu: 0.0.40
codegen_flags: <defaults>
</compile_context>

<pallas_src>
import functools

import numpy as np
import jax
import jax.numpy as jnp
from jax.experimental import pallas as pl
from jax.experimental.pallas import tpu as pltpu


_BN_EVAL_SCALE = 1.0 / float(np.sqrt(1.0 + 1e-5))


def _pick_tile(n, target, multiple=8):
    """Largest divisor of n that is a multiple of `multiple` and <= target.

    Falls back to the full extent n (always a legal BlockSpec block size)."""
    if n <= target:
        return n
    best = 0
    d = multiple
    while d <= target:
        if n % d == 0:
            best = d
        d += multiple
    return best if best > 0 else n


# ---------------------------------------------------------------------------
# Kernel 1: compute_graph  D[b,i,j] = | ||h_i||^2 + ||h_j||^2 - 2 h_i.h_j |
# Tiled (TN x TN) over the N x N output so VMEM stays flat for large N.
# ---------------------------------------------------------------------------
def _graph_kernel(hi_ref, hj_ref, sqj_ref, d_ref):
    hi = hi_ref[...]                                               # [TN, F]
    hj = hj_ref[...]                                               # [TN, F]
    # contraction on the last dim of both operands -> no explicit transpose
    g = jax.lax.dot_general(hi, hj, (((1,), (1,)), ((), ())),
                            preferred_element_type=jnp.float32)    # [TN, TN]
    sqi = jnp.sum(hi * hi, axis=1, keepdims=True)                  # [TN, 1]
    sqj = sqj_ref[...]                                             # [1, TN]
    d_ref[...] = jnp.abs(sqi + sqj - 2.0 * g)


def compute_graph_pallas(h, tile_target=512):
    B, N, F = h.shape
    TN = _pick_tile(N, tile_target, multiple=128)                  # lane-aligned
    sq = jnp.sum(h * h, axis=2).reshape(B, 1, N)                   # row norms (XLA, tiny)
    grid = (B, N // TN, N // TN)
    return pl.pallas_call(
        _graph_kernel,
        out_shape=jax.ShapeDtypeStruct((B, N, N), jnp.float32),
        grid=grid,
        in_specs=[
            pl.BlockSpec((None, TN, F), lambda b, i, j: (b, i, 0)),
            pl.BlockSpec((None, TN, F), lambda b, i, j: (b, j, 0)),
            pl.BlockSpec((None, 1, TN), lambda b, i, j: (b, 0, j)),
        ],
        out_specs=pl.BlockSpec((None, TN, TN), lambda b, i, j: (b, i, j)),
        compiler_params=pltpu.CompilerParams(
            dimension_semantics=("parallel", "parallel", "parallel")),
    )(h, h, sq)


# ---------------------------------------------------------------------------
# Kernel 2: GConv core (everything after the kNN gather).
# Inputs are neighbour-major [min_nn, TP, F] per tile; a short static loop over
# the min_nn neighbours accumulates the distance-weighted outputs per point.
#
# Per neighbour k:
#   l0     = leaky_relu(labels_k @ W0 + b0, 0.02)
#   big    = l0 @ [W1e | W2e | Wl]          (roll folded into W1e/W2e columns)
#   theta1 = big[:, :R*F] (+ b1),  theta2 = big[:, R*F:R*F+R*O] (+ b2)
#   thetal = big[:, R*F+R*O:] + bl
#   xr     = sum_i theta1[:, r, i] * xt1[:, i]      (replicate + segment matmuls)
#   y      = sum_r theta2[:, r, :] * (xr * thetal)[:, r]  (+ (xr*thetal) @ b2)
#   acc   += exp(-||labels_k||^2 / 10) * y
# ---------------------------------------------------------------------------
def _gconv_kernel(lab_ref, xt1_ref, w0_ref, b0_ref, wbig_ref, bl_ref,
                  b1t_ref, b2_ref, rep1_ref, seg1_ref, rep2_ref, seg2_ref,
                  out_ref, *, min_nn, rank, in_feat, out_feat, compute_dtype):
    F, R, O = in_feat, rank, out_feat
    RF, RO = R * F, R * O
    cd = compute_dtype
    TP = out_ref.shape[0]

    w0 = w0_ref[...].astype(cd)
    wbig = wbig_ref[...].astype(cd)
    b1t = b1t_ref[...].astype(cd)
    b2 = b2_ref[...].astype(cd)
    rep1 = rep1_ref[...].astype(cd)
    seg1 = seg1_ref[...].astype(cd)
    rep2 = rep2_ref[...].astype(cd)
    seg2 = seg2_ref[...].astype(cd)
    b0 = b0_ref[...]
    bl = bl_ref[...]

    acc = jnp.zeros((TP, O), jnp.float32)
    for k in range(min_nn):                       # static unroll, min_nn small
        lab = lab_ref[k]                          # [TP, F]
        xt1 = xt1_ref[k]                          # [TP, F]
        d = jnp.sum(lab * lab, axis=1, keepdims=True)                    # [TP, 1]

        # fnet layer 0 + LeakyReLU(0.02)
        l0 = jnp.dot(lab.astype(cd), w0, preferred_element_type=jnp.float32) + b0
        l0 = jnp.where(l0 >= 0.0, l0, 0.02 * l0)

        # fused W1e | W2e | Wl matmul; 128-aligned lane slices
        big = jnp.dot(l0.astype(cd), wbig, preferred_element_type=jnp.float32)
        T1 = big[:, :RF]                                                 # [TP, R*F]
        T2 = big[:, RF:RF + RO]                                          # [TP, R*O]
        thetal = big[:, RF + RO:] + bl                                   # [TP, R]

        xt1c = xt1.astype(cd)
        xb1 = jnp.dot(xt1c, b1t, preferred_element_type=jnp.float32)     # [TP, R]
        # xr[m, r] = sum_i theta1[m, r, i] * xt1[m, i]
        xt1_rep = jnp.dot(xt1c, rep1, preferred_element_type=jnp.float32)  # [TP, R*F]
        xr = jnp.dot((T1 * xt1_rep).astype(cd), seg1,
                     preferred_element_type=jnp.float32) + xb1           # [TP, R]
        xs = xr * thetal                                                 # [TP, R]
        xsc = xs.astype(cd)
        # y[m, o] = sum_r theta2[m, r, o] * xs[m, r]
        xs_rep = jnp.dot(xsc, rep2, preferred_element_type=jnp.float32)  # [TP, R*O]
        y = (jnp.dot((T2 * xs_rep).astype(cd), seg2,
                     preferred_element_type=jnp.float32)
             + jnp.dot(xsc, b2, preferred_element_type=jnp.float32))     # [TP, O]

        acc = acc + y * jnp.exp(-d / 10.0)
    out_ref[...] = acc


def gconv_core(lab_nm, xt1_nm, params, cfg, compute_dtype=jnp.float32,
               tile_target=256):
    B, mn, N, F = lab_nm.shape
    assert mn == cfg['min_nn'] and F == cfg['in_feat']
    R, O = cfg['rank_theta'], cfg['out_feat']
    TP = _pick_tile(N, tile_target, multiple=8)
    grid = (B, N // TP)

    kern = functools.partial(_gconv_kernel, min_nn=mn, rank=R, in_feat=F,
                             out_feat=O, compute_dtype=compute_dtype)

    def wspec(a):
        zeros = (0,) * a.ndim
        return pl.BlockSpec(a.shape, lambda b, i: zeros)

    data_spec = pl.BlockSpec((None, mn, TP, F), lambda b, i: (b, 0, i, 0))

    return pl.pallas_call(
        kern,
        out_shape=jax.ShapeDtypeStruct((B, N, O), jnp.float32),
        grid=grid,
        in_specs=[
            data_spec, data_spec,
            wspec(params['W0']), wspec(params['b0']),
            wspec(params['Wbig']), wspec(params['bl']),
            wspec(params['b1t']), wspec(params['b2']),
            wspec(params['REP1']), wspec(params['SEG1']),
            wspec(params['REP2']), wspec(params['SEG2']),
        ],
        out_specs=pl.BlockSpec((None, TP, O), lambda b, i: (b, i, 0)),
        compiler_params=pltpu.CompilerParams(
            dimension_semantics=("parallel", "parallel")),
    )(lab_nm, xt1_nm, params['W0'], params['b0'], params['Wbig'], params['bl'],
      params['b1t'], params['b2'], params['REP1'], params['SEG1'],
      params['REP2'], params['SEG2'])


# ---------------------------------------------------------------------------
# Kernel 3: fused local branch + lnl_aggregation + BatchNorm(eval) + LeakyReLU.
# Lane-dense: 8 points are packed per row ([rows, 8*F] -> [rows, 8*O]), the 1x1
# conv becomes a block-diagonal [8F, 8O] matmul, so every load/store is a full
# 128-lane access and the h_sl/h_nl tensors never make an extra HBM round-trip.
# ---------------------------------------------------------------------------
def _epilogue_kernel(h_ref, hnl_ref, w_ref, b_ref, o_ref,
                     *, min_nn, last, compute_dtype):
    cd = compute_dtype
    hs = jnp.dot(h_ref[...].astype(cd), w_ref[...].astype(cd),
                 preferred_element_type=jnp.float32)               # local branch
    x = (hs + hnl_ref[...]) / float(min_nn + 1) + b_ref[...]
    if not last:
        x = x * _BN_EVAL_SCALE                 # BatchNorm1d eval, default stats
        x = jnp.where(x >= 0.0, x, 0.2 * x)    # LeakyReLU(0.2)
    o_ref[...] = x


def local_epilogue(h2d, hnl2d, params, cfg, last, compute_dtype=jnp.float32,
                   tile_target=512):
    P, F = h2d.shape
    O, mn = cfg['out_feat'], cfg['min_nn']
    g = 8 if P % 8 == 0 else 1                 # lane-dense packing factor
    rows = P // g
    h_slab = h2d.reshape(rows, g * F)          # free row-major reshape
    hnl_slab = hnl2d.reshape(rows, g * O)
    w_bd = jnp.kron(jnp.eye(g, dtype=h2d.dtype), params['sl_Wc'])   # [gF, gO]
    b_row = jnp.tile(params['sl_b'][:, 0][None, :], (1, g))         # [1, gO]

    TR = _pick_tile(rows, tile_target, multiple=8)
    kern = functools.partial(_epilogue_kernel, min_nn=mn, last=last,
                             compute_dtype=compute_dtype)
    out_slab = pl.pallas_call(
        kern,
        out_shape=jax.ShapeDtypeStruct((rows, g * O), jnp.float32),
        grid=(rows // TR,),
        in_specs=[
            pl.BlockSpec((TR, g * F), lambda i: (i, 0)),
            pl.BlockSpec((TR, g * O), lambda i: (i, 0)),
            pl.BlockSpec((g * F, g * O), lambda i: (0, 0)),
            pl.BlockSpec((1, g * O), lambda i: (0, 0)),
        ],
        out_specs=pl.BlockSpec((TR, g * O), lambda i: (i, 0)),
        compiler_params=pltpu.CompilerParams(dimension_semantics=("parallel",)),
    )(h_slab, hnl_slab, w_bd, b_row)
    return out_slab.reshape(P, O)


# ---------------------------------------------------------------------------
# ConvLayer forward (glue: kNN topk/gather + reshapes; compute in Pallas).
# ---------------------------------------------------------------------------
def conv_layer_forward(h, D, params, cfg, last=False,
                       compute_dtype=jnp.float32):
    B, N, F = h.shape
    mn, O = cfg['min_nn'], cfg['out_feat']
    if D is None:
        D = compute_graph_pallas(h)

    # kNN selection + gather (data-dependent -> JAX glue)
    _, top_idx = jax.lax.top_k(-D, mn + 1)                     # [B, N, mn+1]
    top_self = jnp.repeat(top_idx[:, :, 0], mn, axis=1)        # [B, N*mn]
    top_nb = top_idx[:, :, 1:].reshape(B, N * mn)              # [B, N*mn]
    xt1 = jnp.take_along_axis(h, top_nb[..., None], axis=1)    # [B, N*mn, F]
    xt2 = jnp.take_along_axis(h, top_self[..., None], axis=1)  # [B, N*mn, F]
    labels = xt1 - xt2
    # neighbour-major per batch: [B, min_nn, N, F]
    xt1_nm = xt1.reshape(B, N, mn, F).transpose(0, 2, 1, 3)
    lab_nm = labels.reshape(B, N, mn, F).transpose(0, 2, 1, 3)

    # non-local branch (GConv hot path in Pallas) -> [B, N, O] in point order
    h_nl = gconv_core(lab_nm, xt1_nm, params, cfg, compute_dtype)
    # replicate torch's `.reshape(-1, out_feat, N)` scramble, then bring it to
    # point-major rows so the epilogue works in the final [B, N, O] layout.
    h_nl_pm = h_nl.reshape(B, O, N).transpose(0, 2, 1).reshape(B * N, O)

    # fused conv1d(k=1) + lnl_aggregation + BN + LeakyReLU epilogue
    out2d = local_epilogue(h.reshape(B * N, F), h_nl_pm, params, cfg, last,
                           compute_dtype)
    return out2d.reshape(B, N, O), D


# ---------------------------------------------------------------------------
# Deterministic parameter init (shapes from ConvLayer / GConv __init__).
# Biases are given small random values (torch zero-inits them) so the
# self-check below actually exercises every bias path.
# ---------------------------------------------------------------------------
def init_params(key, cfg):
    F, Fn, O, R = cfg['in_feat'], cfg['fnet_feat'], cfg['out_feat'], cfg['rank_theta']
    S1, S2 = int(cfg['stride_th1']), int(cfg['stride_th2'])
    assert Fn == F, "GPDNet's GConv implicitly requires fnet_feat == in_feat"
    ks = jax.random.split(key, 10)
    W0 = jax.random.normal(ks[0], (F, Fn), jnp.float32) * np.sqrt(2.0 / (F + Fn))
    b0 = 0.1 * jax.random.normal(ks[1], (1, Fn), jnp.float32)
    W1 = jax.random.normal(ks[2], (Fn, S1 * R), jnp.float32) / (np.sqrt(Fn) * np.sqrt(F))
    b1 = 0.1 * jax.random.normal(ks[3], (R, F), jnp.float32)
    W2 = jax.random.normal(ks[4], (Fn, S2 * R), jnp.float32) / (np.sqrt(Fn) * np.sqrt(F))
    b2 = 0.1 * jax.random.normal(ks[5], (R, O), jnp.float32)
    Wl = jax.random.normal(ks[6], (Fn, R), jnp.float32) / np.sqrt(float(R))
    bl = 0.1 * jax.random.normal(ks[7], (1, R), jnp.float32)
    sl_W = jax.random.normal(ks[8], (O, F, 1), jnp.float32) * np.sqrt(2.0 / (F + O))
    sl_b = 0.1 * jax.random.normal(ks[9], (O, 1), jnp.float32)

    # Fold myroll (roll of activations) into rolled weight rows:
    #   sum_f roll(l0, s)[f] * W[f, j] == sum_g l0[g] * roll(W, -s, axis=0)[g, j]
    def fold(W, stride, nblk):
        shifts = [0] + [(ss + 1) * stride for ss in range(1, nblk)]
        return jnp.concatenate([jnp.roll(W, -s, axis=0) for s in shifts], axis=1)

    W1e = fold(W1, S1, F // S1)                     # [Fn, R*F]
    W2e = fold(W2, S2, O // S2)                     # [Fn, R*O]
    Wbig = jnp.concatenate([W1e, W2e, Wl], axis=1)  # [Fn, R*F + R*O + R]

    # constant replicate / segment-sum matrices for the vectorized rank loop
    REP1 = jnp.asarray(np.tile(np.eye(F, dtype=np.float32), (1, R)))                       # [F, R*F]
    SEG1 = jnp.asarray(np.kron(np.eye(R, dtype=np.float32), np.ones((F, 1), np.float32)))  # [R*F, R]
    REP2 = jnp.asarray(np.kron(np.eye(R, dtype=np.float32), np.ones((1, O), np.float32)))  # [R, R*O]
    SEG2 = jnp.asarray(np.tile(np.eye(O, dtype=np.float32), (R, 1)))                       # [R*O, O]

    return dict(
        W0=W0, b0=b0, W1=W1, b1=b1, W2=W2, b2=b2, Wl=Wl, bl=bl,
        sl_W=sl_W, sl_b=sl_b,
        Wbig=Wbig, b1t=b1.T, sl_Wc=sl_W[:, :, 0].T,
        REP1=REP1, SEG1=SEG1, REP2=REP2, SEG2=SEG2,
    )


# ---------------------------------------------------------------------------
# Pure-JAX transcription of the PyTorch forward (validation only).
# ---------------------------------------------------------------------------
def reference_compute_graph(h):
    sq = jnp.sum(h * h, axis=2)
    return jnp.abs(sq[:, :, None] + sq[:, None, :]
                   - 2.0 * jnp.einsum('bnf,bmf->bnm', h, h))


def reference_forward(h, D, params, cfg, last=False):
    B, N, F = h.shape
    mn, R, O = cfg['min_nn'], cfg['rank_theta'], cfg['out_feat']
    S1, S2 = int(cfg['stride_th1']), int(cfg['stride_th2'])
    _, top_idx = jax.lax.top_k(-D, mn + 1)
    top_self = jnp.repeat(top_idx[:, :, 0], mn, axis=1)
    top_nb = top_idx[:, :, 1:].reshape(B, N * mn)
    xt1 = jnp.take_along_axis(h, top_nb[..., None], axis=1)
    xt2 = jnp.take_along_axis(h, top_self[..., None], axis=1)
    labels3 = xt1 - xt2
    xt1f = xt1.reshape(-1, F)
    labf = labels3.reshape(-1, F)
    d_labels = jnp.sum(labf * labf, axis=1).reshape(-1, mn)
    l0 = labf @ params['W0'] + params['b0']
    l0 = jnp.where(l0 >= 0.0, l0, 0.02 * l0)
    le = l0[:, None, :]

    def roll_last(a, shift):
        d = a.shape[2] - shift
        return jnp.concatenate([a[:, :, d:], a[:, :, :d]], axis=2)

    labels1 = le
    for ss in range(1, F // S1):
        labels1 = jnp.concatenate([labels1, roll_last(le, (ss + 1) * S1)], axis=1)
    labels2 = le
    for ss in range(1, O // S2):
        labels2 = jnp.concatenate([labels2, roll_last(le, (ss + 1) * S2)], axis=1)
    theta1 = (labels1.reshape(-1, F) @ params['W1']).reshape(-1, R, F) + params['b1'][None]
    theta2 = (labels2.reshape(-1, F) @ params['W2']).reshape(-1, R, O) + params['b2'][None]
    thetal = (l0 @ params['Wl'] + params['bl'])[:, :, None]
    x = jnp.einsum('mri,mi->mr', theta1, xt1f)[:, :, None]
    x = x * thetal
    x = jnp.einsum('mro,mr->mo', theta2, x[:, :, 0])
    x = x.reshape(-1, mn, O) * jnp.exp(-d_labels / 10.0)[:, :, None]
    h_nl = jnp.sum(x, axis=1).reshape(-1, O, N)
    h_sl = jnp.einsum('oi,bni->bon', params['sl_W'][:, :, 0], h)
    hh = (h_sl + h_nl) / (mn + 1) + params['sl_b'][None]
    if not last:
        hh = hh * _BN_EVAL_SCALE
        hh = jnp.where(hh >= 0.0, hh, 0.2 * hh)
    return hh.transpose(0, 2, 1), D


if __name__ == "__main__":
    cfg = dict(in_feat=16, fnet_feat=16, out_feat=16, rank_theta=8,
               stride_th1=4, stride_th2=4, min_nn=4)
    B, N = 2, 16
    key = jax.random.PRNGKey(0)
    kh, kp = jax.random.split(key)
    h = jax.random.normal(kh, (B, N, cfg['in_feat']), jnp.float32)
    params = init_params(kp, cfg)

    # f32 path
    out, D = conv_layer_forward(h, None, params, cfg, last=False)
    out = jax.block_until_ready(out)

    # validate against a pure-JAX transcription of the PyTorch forward
    D_ref = reference_compute_graph(h)
    out_ref, _ = reference_forward(h, D, params, cfg, last=False)
    assert jnp.allclose(D, D_ref, rtol=1e-4, atol=1e-4), "compute_graph mismatch"
    assert jnp.allclose(out, out_ref, rtol=1e-3, atol=1e-3), "forward mismatch (f32)"
    assert out.shape == (B, N, cfg['out_feat'])

    # bf16 MXU-operand path (v6e/v7x): bf16 inputs, f32 accumulation
    out_bf16, _ = conv_layer_forward(h, D, params, cfg, last=False,
                                     compute_dtype=jnp.bfloat16)
    out_bf16 = jax.block_until_ready(out_bf16)
    rel = jnp.linalg.norm(out_bf16 - out_ref) / (jnp.linalg.norm(out_ref) + 1e-12)
    assert float(rel) < 5e-2, f"forward mismatch (bf16), rel L2 err {float(rel)}"

    print("KERNEL_OK")
</pallas_src>

<mosaic_0001>
module attributes {stable_mosaic.version = 11 : i64} {
  func.func @_graph_kernel(%arg0: i32, %arg1: i32, %arg2: i32, %arg3: memref<1x16x16xf32, #tpu.memory_space<vmem>>, %arg4: memref<1x16x16xf32, #tpu.memory_space<vmem>>, %arg5: memref<1x1x16xf32, #tpu.memory_space<vmem>>, %arg6: memref<1x16x16xf32, #tpu.memory_space<vmem>>) attributes {dimension_semantics = [#tpu.dimension_semantics<parallel>, #tpu.dimension_semantics<parallel>, #tpu.dimension_semantics<parallel>], iteration_bounds = array<i64: 2, 1, 1>, scalar_prefetch = 0 : i64, scratch_operands = 0 : i64, tpu.core_type = #tpu.core_type<tc>, window_params = [{transform_indices = @transform_0, window_bounds = array<i64: 1, 16, 16>}, {transform_indices = @transform_1, window_bounds = array<i64: 1, 16, 16>}, {transform_indices = @transform_2, window_bounds = array<i64: 1, 1, 16>}, {transform_indices = @transform_3, window_bounds = array<i64: 1, 16, 16>}]} {
    %c0 = arith.constant 0 : index
    %c0_0 = arith.constant 0 : index
    %c0_1 = arith.constant 0 : index
    %0 = vector.load %arg3[%c0, %c0_0, %c0_1] : memref<1x16x16xf32, #tpu.memory_space<vmem>>, vector<1x16x16xf32>
    %1 = vector.shape_cast %0 : vector<1x16x16xf32> to vector<16x16xf32>
    %c0_2 = arith.constant 0 : index
    %c0_3 = arith.constant 0 : index
    %c0_4 = arith.constant 0 : index
    %2 = vector.load %arg4[%c0_2, %c0_3, %c0_4] : memref<1x16x16xf32, #tpu.memory_space<vmem>>, vector<1x16x16xf32>
    %3 = vector.shape_cast %2 : vector<1x16x16xf32> to vector<16x16xf32>
    %cst = arith.constant dense<0.000000e+00> : vector<16x16xf32>
    %4 = tpu.matmul %1, %3, %cst {dimension_numbers = #tpu.dot_dimension_numbers<[1], [1], [0], [0], [0, 0, 1, 0], [], []>} : vector<16x16xf32>, vector<16x16xf32>, vector<16x16xf32> -> vector<16x16xf32>
    %5 = arith.mulf %1, %1 : vector<16x16xf32>
    %cst_5 = arith.constant dense<0.000000e+00> : vector<16xf32>
    %6 = vector.multi_reduction <add>, %5, %cst_5 [1] : vector<16x16xf32> to vector<16xf32>
    %7 = vector.shape_cast %6 : vector<16xf32> to vector<16x1xf32>
    %c0_6 = arith.constant 0 : index
    %c0_7 = arith.constant 0 : index
    %c0_8 = arith.constant 0 : index
    %8 = vector.load %arg5[%c0_6, %c0_7, %c0_8] : memref<1x1x16xf32, #tpu.memory_space<vmem>>, vector<1x1x16xf32>
    %9 = vector.shape_cast %8 : vector<1x1x16xf32> to vector<1x16xf32>
    %10 = vector.broadcast %7 : vector<16x1xf32> to vector<16x16xf32>
    %11 = vector.broadcast %9 : vector<1x16xf32> to vector<16x16xf32>
    %12 = arith.addf %10, %11 : vector<16x16xf32>
    %cst_9 = arith.constant 2.000000e+00 : f32
    %13 = vector.broadcast %cst_9 : f32 to vector<16x16xf32>
    %14 = arith.mulf %13, %4 : vector<16x16xf32>
    %15 = arith.subf %12, %14 : vector<16x16xf32>
    %16 = math.absf %15 : vector<16x16xf32>
    %c0_10 = arith.constant 0 : index
    %c0_11 = arith.constant 0 : index
    %c0_12 = arith.constant 0 : index
    %17 = vector.load %arg6[%c0_10, %c0_11, %c0_12] : memref<1x16x16xf32, #tpu.memory_space<vmem>>, vector<1x16x16xf32>
    %18 = vector.shape_cast %17 : vector<1x16x16xf32> to vector<16x16xf32>
    %19 = vector.shape_cast %16 : vector<16x16xf32> to vector<1x16x16xf32>
    tpu.vector_store %arg6[%c0_10, %c0_11, %c0_12], %19 {strides = array<i32>} : memref<1x16x16xf32, #tpu.memory_space<vmem>>, vector<1x16x16xf32>,
    return
  }
  func.func @transform_0(%arg0: i32, %arg1: i32, %arg2: i32) -> (i32, i32, i32) {
    %c0_i32 = arith.constant 0 : i32
    %c0_i32_0 = arith.constant 0 : i32
    return %arg0, %arg1, %c0_i32 : i32, i32, i32
  }
  func.func @transform_1(%arg0: i32, %arg1: i32, %arg2: i32) -> (i32, i32, i32) {
    %c0_i32 = arith.constant 0 : i32
    %c0_i32_0 = arith.constant 0 : i32
    return %arg0, %arg2, %c0_i32 : i32, i32, i32
  }
  func.func @transform_2(%arg0: i32, %arg1: i32, %arg2: i32) -> (i32, i32, i32) {
    %c0_i32 = arith.constant 0 : i32
    %c0_i32_0 = arith.constant 0 : i32
    return %arg0, %c0_i32, %arg2 : i32, i32, i32
  }
  func.func @transform_3(%arg0: i32, %arg1: i32, %arg2: i32) -> (i32, i32, i32) {
    %c0_i32 = arith.constant 0 : i32
    return %arg0, %arg1, %arg2 : i32, i32, i32
  }
}

</mosaic_0001>

<bundles_post_ra>
// kernel: tpu_custom_call.1
= control target key start
LH: loop header
LB: loop body
LE: loop exit
PB: predicated region body
PF: predicated region fallthrough
CT: control target
= control target key end

     0   :  { %8 = vsyncpa [#allocation3], 0  ;;  %s1095_s0 = inlined_call_operand.hbm [shape: f32[2,16,16], index: 0, kind: input, shape index: {}]   ;;  %s1096_s1 = inlined_call_operand.hbm [shape: f32[2,16,16], index: 1, kind: input, shape index: {}]   ;;  %s1097_s2 = inlined_call_operand.vmem [shape: f32[2,1,16], index: 2, kind: input, shape index: {}]   ;;  %s1098_s3 = inlined_call_operand.hbm [shape: f32[2,16,16], index: 3, kind: output, shape index: {}]  }
   0x1   :  { %10 = vsyncpa [#allocation3 + $0x1], 0 }
   0x2   :  { %11 = vsyncpa [#allocation6], 0 }
   0x3   :  { %13 = vsyncpa [#allocation6 + $0x1], 0 }
   0x4   :  { %14 = vsyncpa [#allocation4], 0 }
   0x5   :  { %16 = vsyncpa [#allocation4 + $0x1], 0  ;;  %s841_s12 = smov 0   ;;  %s843_s13 = smov 0  }
   0x6   :  { %s845_s14 = smov 0   ;;  %s847_s15 = smov 0  }
   0x7   :  { %s849_s16 = smov 0   ;;  %s851_s17 = smov 0  }
   0x8 LB: > { %s551_s18 = sadd.s32 4294967295, %s812_s17   ;;  %s552_s19 = sadd.s32 4294967294, %s812_s17   ;;  %s812_s17 = sphi %s851_s17, %s22_s17   ;;  %s808_s16 = sphi %s849_s16, %s1116_s16   ;;  %s804_s15 = sphi %s847_s15, %s1115_s15   ;;  %s800_s14 = sphi %s845_s14, %s1114_s14   ;;  %s796_s13 = sphi %s843_s13, %s1113_s13   ;;  %s792_s12 = sphi %s841_s12, %s1112_s12  }
   0x9   : > { %s41_s20 = sadd.s32 1, %s808_s16  ;;  %s50_s21 = sadd.s32 1, %s800_s14 }
   0xa   : > { %p43_p0 = scmp.ge.s32.totalorder %s41_s20, 2  ;;  %p57_p1 = scmp.ne.s32.totalorder %s800_s14, %s796_s13 }
   0xb   : > { %p58_p2 = scmp.eq.s32.totalorder %s812_s17, 0  ;;  %p63_p3 = scmp.ne.s32.totalorder %s796_s13, %s792_s12 }
   0xc   : > { %s1118_s20 = smov (%p43_p0, %s41_s20), 0  ;;  %p64_p5 = scmp.eq.s32.totalorder %s551_s18, 0 }
   0xd   : > { %p882_p4 = por %p58_p2, %p57_p1  ;;  %s45_s23 = ssub.s32 %s808_s16, %s1118_s20 }
   0xe   : > { %p147_p6 = scmp.eq.s32.totalorder %s551_s18, 1  ;;  %p48_p7 = scmp.eq.s32.totalorder %s45_s23, 0 }
   0xf   : > { %p888_p8 = por %p64_p5, %p63_p3  ;;  %p153_p10 = scmp.eq.s32.totalorder %s552_s19, 1 }
  0x10   : > { %p892_p9 = por %p147_p6, %p57_p1  ;;  %p612_p13 = scmp.lt.s32.totalorder %s812_s17, 2 }
  0x11   : > { %s1102_s24 = scalar_select %p888_p8, 1, 0 }
  0x12   : > { %s1103_s25 = scalar_select %p892_p9, 1, 0 }
  0x13   : > { %s897_s26 = scalar_select %p48_p7, %s800_s14, %s50_s21  }
  0x14   : > { %p899_p11 = por %p153_p10, %p63_p3  ;;  %s906_s28 = sand.u32 1, %s800_s14  }
  0x15   : > { %s555_s29 = sshll.u32 %s906_s28, 4  ;;  %s575_s30 = sshll.u32 %s808_s16, 8 }
  0x16   : > { %s1104_s27 = scalar_select %p899_p11, 1, 0 }
  0x17   : > { %s915_s6 = scalar_lea.hbm %s1095_s0, %s575_s30  ;;  %s177_s7 = scalar_lea.vmem [#allocation2], %s555_s29 }
  0x18   : > { %s186_s8 = sshll.u32 %s177_s7, 4  ;;  %p923_p0 = pnand %p612_p13, %p882_p4  ;;  %s919_s8 = int_to_ptr.vmem [resolvable:$true] %s186_s8 }
  0x19   : > { %s174_s10 = scalar_lea.sflag [#allocation3], %s906_s28  ;;  %s666_s11 = scalar_lea.hbm %s915_s6, 256 }
  0x1a   : > { %p667_p2 = scmp.ne.s32.totalorder %s915_s6, %s666_s11  ;;  %p668_p3 = pneg %p923_p0 }
  0x1b   : > { %s671_s21 = scalar_lea.hbm %s1095_s0, 512  ;;  %p672_p4 = scmp.lt.u32.totalorder %s915_s6, %s1095_s0 }
  0x1c   : > { %p669_p5 = pnand %p668_p3, %p667_p2  ;;  %p673_p7 = scmp.lt.u32.totalorder %s671_s21, %s666_s11 }
  0x1d   : > { %p675_p13 = scmp.lt.u32.totalorder %s666_s11, %s915_s6 }
  0x1e   : > { %p670_p6 = pneg %p669_p5  ;;  %p674_p10 = por %p673_p7, %p672_p4 }
  0x20   : > { %p676_p12 = por %p675_p13, %p674_p10 }
  0x22   : > { %p677_p1 = pnand %p676_p12, %p670_p6 }
  0x24   : > { %680 = shalt.err (!%p677_p1)
}
  0x25   : > { %s681_s4 = scalar_lea.vmem %s919_s8, 256  ;;  %s814_s5 = smov [#allocation2]  }
  0x26   : > { %p682_p2 = scmp.ne.s32.totalorder %s919_s8, %s681_s4  ;;  %s686_s7 = sshll.u32 %s814_s5, 4  ;;  %s687_s7 = int_to_ptr.vmem [resolvable:$false] %s686_s7 }
  0x27   : > { %s688_s18 = scalar_lea.vmem %s687_s7, 512  ;;  %p689_p9 = scmp.lt.s32.totalorder %s919_s8, %s687_s7 }
  0x28   : > { %p684_p5 = pnand %p682_p2, %p668_p3  ;;  %p690_p4 = scmp.lt.s32.totalorder %s688_s18, %s681_s4 }
  0x2a   : > { %p685_p11 = pneg %p684_p5  ;;  %p691_p7 = por %p690_p4, %p689_p9 }
  0x2c   : > { %p692_p10 = pnand %p691_p7, %p685_p11 }
  0x2e   : > { %695 = shalt.err (!%p692_p10)
}
  0x2f   : > { %s815_s11 = smov 128   ;;  %s816_s19 = smov 8  }
  0x30   : > { %604 = dma.hbm_to_vmem [thread:$0]  (!%p923_p0), %s915_s6, 256, %s919_s8, %s174_s10, %s815_s11, %s815_s11, %s816_s19  }
  0x31   : > { %p226_p9 = scmp.lt.s32.totalorder %s812_s17, 3  ;;  %s965_s23 = scalar_lea.hbm %s1096_s1, %s575_s30 }
  0x32   : > { %p1106_p11 = scmp.ge.s32.totalorder %s812_s17, 1  ;;  %s200_s5 = scalar_lea.vmem [#allocation5], %s555_s29 }
  0x33   : > { %s209_s7 = sshll.u32 %s200_s5, 4  ;;  %s197_s6 = scalar_lea.sflag [#allocation6], %s906_s28  ;;  %s975_s7 = int_to_ptr.vmem [resolvable:$true] %s209_s7 }
  0x34   : > { %p969_p12 = pnand %p1106_p11, %p226_p9  ;;  %s696_s8 = scalar_lea.hbm %s965_s23, 256 }
  0x35   : > { %p697_p1 = scmp.ne.s32.totalorder %s965_s23, %s696_s8  ;;  %s701_s18 = scalar_lea.hbm %s1096_s1, 512 }
  0x36   : > { %p702_p2 = scmp.lt.u32.totalorder %s965_s23, %s1096_s1  ;;  %p703_p5 = scmp.lt.u32.totalorder %s701_s18, %s696_s8 }
  0x37   : > { %p699_p6 = pnand %p697_p1, %p668_p3  ;;  %p705_p7 = scmp.lt.u32.totalorder %s696_s8, %s965_s23 }
  0x38   : > { %p704_p4 = por %p703_p5, %p702_p2 }
  0x39   : > { %p700_p13 = pneg %p699_p6 }
  0x3a   : > { %p706_p10 = por %p705_p7, %p704_p4 }
  0x3c   : > { %p707_p9 = pnand %p706_p10, %p700_p13 }
  0x3e   : > { %710 = shalt.err (!%p707_p9)
}
  0x3f   : > { %s711_s29 = scalar_lea.vmem %s975_s7, 256  ;;  %s817_s5 = smov [#allocation5]  }
  0x40   : > { %p712_p11 = scmp.ne.s32.totalorder %s975_s7, %s711_s29  ;;  %s716_s30 = sshll.u32 %s817_s5, 4  ;;  %s717_s30 = int_to_ptr.vmem [resolvable:$false] %s716_s30 }
  0x41   : > { %s718_s10 = scalar_lea.vmem %s717_s30, 512  ;;  %p719_p8 = scmp.lt.s32.totalorder %s975_s7, %s717_s30 }
  0x42   : > { %p714_p1 = pnand %p712_p11, %p668_p3  ;;  %p720_p2 = scmp.lt.s32.totalorder %s718_s10, %s711_s29 }
  0x44   : > { %p715_p6 = pneg %p714_p1  ;;  %p721_p5 = por %p720_p2, %p719_p8 }
  0x46   : > { %p722_p4 = pnand %p721_p5, %p715_p6 }
  0x48   : > { %725 = shalt.err (!%p722_p4)
}
  0x49   : > { %607 = dma.hbm_to_vmem [thread:$0]  (!%p923_p0), %s965_s23, 256, %s975_s7, %s197_s6, %s815_s11, %s815_s11, %s816_s19  }
  0x4a   : > { %230 = sbr.rel (%p969_p12) target bundleno = 329 (0x149), region = 32  ;;  %s1009_s8 = sand.u32 (!%p969_p12), 1, %s796_s13  }
  0x4b   : > { %s1012_s18 = sshll.u32 (!%p969_p12), %s1009_s8, 4  ;;  %s233_s9 = scalar_lea.sflag (!%p969_p12), [#allocation3], %s1009_s8 }
  0x4c   : > { %s236_s21 = scalar_lea.vmem (!%p969_p12), [#allocation2], %s1012_s18  ;;  %p1108_p8 = scmp.ne.s32.totalorder (!%p969_p12), %s1102_s24, 0 }
  0x51   : > { %779 = dma.done.wait (%p1108_p8), %s233_s9, 256  }
  0x52   : > { %781 = vsyncadd (%p1108_p8), %s233_s9, 4294967040  ;;  %s242_s28 = scalar_lea.sflag [#allocation6], %s1009_s8  ;;  %s245_s11 = scalar_lea.vmem [#allocation5], %s1012_s18 }
  0x53   : > { %783 = dma.done.wait (%p1108_p8), %s242_s28, 256  }
  0x54   : > { %785 = vsyncadd (%p1108_p8), %s242_s28, 4294967040  ;;  %vm292_vm0 = vcmask 130048   ;;  %v290_v0 = vld [vmem:[%s245_s11] sm:$0xff]  ;;  %v291_v1 = vld [vmem:[%s245_s11 + $0x8] sm:$0xff]  ;;  %p281_p0 = scmp.lt.s32.totalorder %s804_s15, 1  ;;  %s577_s7 = sshll.u32 %s804_s15, 8 }
  0x55   : > { %vm590_vm1 = vmpackc.low %vm292_vm0, %vm292_vm0  ;;  %v288_v2 = vld [vmem:[%s236_s21] sm:$0xff]  ;;  %v589_v3 = vpack.c.bf16 %v291_v1, %v290_v0  ;;  %v289_v5 = vld [vmem:[%s236_s21 + $0x8] sm:$0xff]  ;;  %s278_s6 = scalar_lea.vmem [#allocation7], %s1012_s18  ;;  %s1042_s30 = scalar_lea.hbm %s1098_s3, %s577_s7 }
  0x56   : > { %586 = vmatprep.mubr.msk.f32.mxu0 %vm292_vm0, %v288_v2  ;;  %v380_v4 = vmul.f32 %v288_v2, %v288_v2  ;;  %v381_v6 = vmul.f32 %v289_v5, %v289_v5  ;;  %s282_s24 = scalar_select %p281_p0, %s804_s15, 1 }
  0x57   : > { %591 = vmatprep.subr.msk.bf16.mxu0 %vm590_vm1, %v589_v3  ;;  %s422_s22 = sshll.u32 %s278_s6, 4  ;;  %s406_s15 = scalar_lea.sflag [#allocation4], %s1009_s8  ;;  %s1044_s22 = int_to_ptr.vmem [resolvable:$true] %s422_s22 }
  0x58   : > { %v382_v7 = vsel %vm292_vm0, %v380_v4, 0.0  ;;  %594 = vmatpush3.bf16.xpose.msk.msra.mxu0 %vm590_vm1, %v589_v3  ;;  %v385_v8 = vsel %vm292_vm0, %v381_v6, 0.0  ;;  %s286_s4 = scalar_lea.vmem %s1097_s2, %s282_s24  ;;  %s726_s10 = scalar_lea.vmem %s1044_s22, 256 }
  0x59   : > { %383 = vadd.xlane.f32.xlu0 %v382_v7  ;;  %v569_v11 = vld [vmem:[%s286_s4] ss:$0 sm:$0xff]  ;;  %p727_p3 = scmp.ne.s32.totalorder %s1044_s22, %s726_s10  ;;  %p1109_p12 = scmp.ne.s32.totalorder %s1103_s25, 0 }
  0x5a   : > { %s818_s18 = smov [#allocation7]  }
  0x5b   : > { %p728_p13 = pnand %p727_p3, %p1109_p12  ;;  %s730_s9 = sshll.u32 %s818_s18, 4  ;;  %s731_s9 = int_to_ptr.vmem [resolvable:$false] %s730_s9 }
  0x5c   : > { %s732_s21 = scalar_lea.vmem %s731_s9, 512  ;;  %p733_p10 = scmp.lt.s32.totalorder %s1044_s22, %s731_s9 }
  0x5d   : > { %386 = vadd.xlane.f32.xlu0 %v385_v8  ;;  %p729_p7 = pneg %p728_p13  ;;  %p734_p9 = scmp.lt.s32.totalorder %s732_s21, %s726_s10 }
  0x5f   : > { %587 = vmatmul.mubr.msk.f32.vlgmr.msra.gmra.mrb[0].mxu0 %vm292_vm0, %v289_v5  ;;  %p735_p11 = por %p734_p9, %p733_p10 }
  0x61   : > { %p736_p1 = pnand %p735_p11, %p729_p7 }
  0xe6   : > { %v384_v9 = vpop.xlane.xlu0 %383 }
  0xe7   : > { %v395_v16 = vadd.f32 %v569_v11, %v384_v9 }
  0xea   : > { %v387_v10 = vpop.xlane.xlu0 %386 }
  0xeb   : > { %v396_v12 = vadd.f32 %v569_v11, %v387_v10 }
 0x132   : > { %v588_v13 = vpop.f32.mrb[0].mxu0 }
 0x133   : > { %v398_v14 = vmul.f32 2.0, %v588_v13  ;;  %v371_v15 = vpop.f32.mrb[1].mxu0 }
 0x134   : > { %v397_v17 = vmul.f32 2.0, %v371_v15 }
 0x135   : > { %v400_v18 = vsub.f32 %v396_v12, %v398_v14 }
 0x136   : > { %v399_v19 = vsub.f32 %v395_v16, %v397_v17 }
 0x137   : > { %v402_v20 = vand.u32 2147483647, %v400_v18 }
 0x138   : > { %v401_v21 = vand.u32 2147483647, %v399_v19 }
 0x139   : > { %404 = vst.msk [vmem:[%s278_s6 + $0x8] sm:$0xff] %vm292_vm0, %v402_v20 }
 0x13a   : > { %403 = vst.msk [vmem:[%s278_s6] sm:$0xff] %vm292_vm0, %v401_v21 }
 0x13b   : > { %739 = shalt.err (!%p736_p1)
}
 0x13c   : > { %s740_s28 = scalar_lea.hbm %s1042_s30, 256  ;;  %s744_s19 = scalar_lea.hbm %s1098_s3, 512 }
 0x13d   : > { %p741_p6 = scmp.ne.s32.totalorder %s1042_s30, %s740_s28  ;;  %p745_p4 = scmp.lt.u32.totalorder %s1042_s30, %s1098_s3 }
 0x13e   : > { %p746_p8 = scmp.lt.u32.totalorder %s744_s19, %s740_s28  ;;  %p748_p3 = scmp.lt.u32.totalorder %s740_s28, %s1042_s30 }
 0x13f   : > { %p742_p2 = pnand %p741_p6, %p1109_p12 }
 0x140   : > { %p747_p0 = por %p746_p8, %p745_p4 }
 0x141   : > { %p743_p5 = pneg %p742_p2 }
 0x142   : > { %p749_p13 = por %p748_p3, %p747_p0 }
 0x144   : > { %p750_p7 = pnand %p749_p13, %p743_p5 }
 0x146   : > { %753 = shalt.err (!%p750_p7)
}
 0x147   : > { %s819_s7 = smov 128   ;;  %s820_s6 = smov 8  }
 0x148   : > { %599 = dma.vmem_to_hbm [thread:$0]  (%p1109_p12), %s1044_s22, 256, %s1042_s30, %s406_s15, %s819_s7, %s819_s7, %s820_s6  }
 0x149 PF: > { %s437_s29 = sand.u32 1, %s792_s12   ;;  %p1110_p10 = scmp.ne.s32.totalorder %s1104_s27, 0 }
 0x14a   : > { %p1111_p9 = scmp.ge.s32.totalorder %s812_s17, 2  ;;  %s438_s5 = scalar_lea.sflag [#allocation4], %s437_s29 }
 0x14c   : > { %p609_p11 = pnand %p1111_p9, %p1110_p10 }
 0x14e   : > { %787 = dma.done.wait (!%p609_p11), %s438_s5, 256  }
 0x14f   : > { %789 = vsyncadd (!%p609_p11), %s438_s5, 4294967040  ;;  %s22_s17 = sadd.s32 1, %s812_s17   ;;  %s1112_s12 = smov %s796_s13 }
 0x150   : > { %p19_p1 = scmp.ge.s32.totalorder %s22_s17, 4   ;;  %s1113_s13 = smov %s800_s14 }
 0x151   : > { %s1114_s14 = smov %s897_s26  ;;  %s1115_s15 = smov %s808_s16 }
 0x152   : > { %s1116_s16 = smov %s1118_s20  ;;  %21 = sbr.rel (!%p19_p1) target bundleno = 8 (0x8), region = 93 }
 0x159   :  { %443 = vsyncpa [#allocation3], 1 }
 0x15a   :  { %445 = vsyncpa [#allocation3 + $0x1], 1 }
 0x15b   :  { %446 = vsyncpa [#allocation6], 1 }
 0x15c   :  { %448 = vsyncpa [#allocation6 + $0x1], 1 }
 0x15d   :  { %449 = vsyncpa [#allocation4], 1 }
 0x15e   :  { %451 = vsyncpa [#allocation4 + $0x1], 1 }

</bundles_post_ra>
